<compile_context>
chip_gen: v7x
topology: tpu7x:2x2x1
jax: 0.10.0
libtpu: 0.0.40
codegen_flags: <defaults>
</compile_context>

<pallas_src>
import jax
import jax.numpy as jnp
from jax.experimental import pallas as pl
from jax.experimental.pallas import tpu as pltpu

IN_DIM = 128
HID_DIM = 4096
OUT_DIM = 1024


def _decode_fc_kernel(x_ref, w1_ref, b1_ref, w2_ref, b2_ref, o_ref, acc_ref):
    k = pl.program_id(2)

    @pl.when(k == 0)
    def _():
        acc_ref[...] = jnp.zeros_like(acc_ref)

    # First linear chunk + ReLU (MXU, bf16 inputs, f32 accumulation, f32 epilogue).
    xb = x_ref[...].astype(jnp.bfloat16)                      # (bm, 128)
    h = jnp.dot(xb, w1_ref[...], preferred_element_type=jnp.float32)   # (bm, tk)
    h = jnp.maximum(h + b1_ref[...], 0.0)                     # bias + ReLU in f32

    # Second linear chunk, accumulated over the hidden (k) axis.
    acc_ref[...] += jnp.dot(h.astype(jnp.bfloat16), w2_ref[...],
                            preferred_element_type=jnp.float32)         # (bm, tn)

    @pl.when(k == pl.num_programs(2) - 1)
    def _():
        y = acc_ref[...] + b2_ref[...]
        o_ref[...] = jax.nn.sigmoid(y).astype(o_ref.dtype)


def my_decode_fc(x, w1, b1, w2, b2, *, tk=512, n_out_split=2):
    """x: (B, 128) float32.  w1: (128, 4096) bf16, b1: (1, 4096) f32,
    w2: (4096, 1024) bf16, b2: (1, 1024) f32.  Returns (B, 1024) float32."""
    B, _ = x.shape
    bm = min(B, 256)
    assert B % bm == 0, "batch must be a multiple of the batch tile"
    assert HID_DIM % tk == 0 and OUT_DIM % n_out_split == 0
    tn = OUT_DIM // n_out_split
    grid = (B // bm, n_out_split, HID_DIM // tk)

    cost = pl.CostEstimate(
        flops=2 * B * (IN_DIM * HID_DIM + HID_DIM * OUT_DIM),
        transcendentals=B * OUT_DIM,
        bytes_accessed=(w1.size * w1.dtype.itemsize + w2.size * w2.dtype.itemsize
                        + b1.size * 4 + b2.size * 4
                        + x.size * 4 + B * OUT_DIM * 4),
    )

    return pl.pallas_call(
        _decode_fc_kernel,
        out_shape=jax.ShapeDtypeStruct((B, OUT_DIM), x.dtype),
        grid_spec=pltpu.PrefetchScalarGridSpec(
            num_scalar_prefetch=0,
            grid=grid,
            in_specs=[
                pl.BlockSpec((bm, IN_DIM), lambda i, j, k: (i, 0)),   # x tile
                pl.BlockSpec((IN_DIM, tk), lambda i, j, k: (0, k)),   # W1 hidden chunk
                pl.BlockSpec((1, tk), lambda i, j, k: (0, k)),        # b1 hidden chunk
                pl.BlockSpec((tk, tn), lambda i, j, k: (k, j)),       # W2 chunk (hid x out-half)
                pl.BlockSpec((1, tn), lambda i, j, k: (0, j)),        # b2 out-half
            ],
            out_specs=pl.BlockSpec((bm, tn), lambda i, j, k: (i, j)),
            scratch_shapes=[pltpu.VMEM((bm, tn), jnp.float32)],       # f32 accumulator
        ),
        compiler_params=pltpu.CompilerParams(
            dimension_semantics=("parallel", "parallel", "arbitrary"),
            vmem_limit_bytes=48 * 1024 * 1024,   # <= v7x's 64 MiB physical VMEM
        ),
        cost_estimate=cost,
    )(x, w1, b1, w2, b2)


def init_params(key):
    """Deterministic init matching nn.Linear shapes (weights transposed to (in, out)).
    Weights stored in bf16 (MXU inputs), biases kept in f32."""
    k1, k2, k3, k4 = jax.random.split(key, 4)
    s1 = 1.0 / jnp.sqrt(IN_DIM)
    s2 = 1.0 / jnp.sqrt(HID_DIM)
    w1 = jax.random.uniform(k1, (IN_DIM, HID_DIM), jnp.float32, -s1, s1).astype(jnp.bfloat16)
    b1 = jax.random.uniform(k2, (1, HID_DIM), jnp.float32, -s1, s1)
    w2 = jax.random.uniform(k3, (HID_DIM, OUT_DIM), jnp.float32, -s2, s2).astype(jnp.bfloat16)
    b2 = jax.random.uniform(k4, (1, OUT_DIM), jnp.float32, -s2, s2)
    return w1, b1, w2, b2


def reference_bf16(x, w1, b1, w2, b2):
    """Same numerics as the kernel: bf16 MXU inputs, f32 accumulation/epilogue."""
    h = jnp.dot(x.astype(jnp.bfloat16), w1, preferred_element_type=jnp.float32) + b1
    h = jnp.maximum(h, 0.0)
    y = jnp.dot(h.astype(jnp.bfloat16), w2, preferred_element_type=jnp.float32) + b2
    return jax.nn.sigmoid(y)


def reference_f32(x, w1, b1, w2, b2):
    h = jnp.maximum(x @ w1.astype(jnp.float32) + b1, 0.0)
    return jax.nn.sigmoid(h @ w2.astype(jnp.float32) + b2)


if __name__ == "__main__":
    key = jax.random.PRNGKey(0)
    kx, kp = jax.random.split(key)
    B = 8  # small decode batch
    x = jax.random.normal(kx, (B, IN_DIM), jnp.float32)
    w1, b1, w2, b2 = init_params(kp)

    out = my_decode_fc(x, w1, b1, w2, b2)
    out = jax.block_until_ready(out)

    ref = reference_bf16(x, w1, b1, w2, b2)
    ref_f32 = reference_f32(x, w1, b1, w2, b2)
    assert out.shape == (B, OUT_DIM)
    assert jnp.allclose(out, ref, atol=2e-3, rtol=2e-3), "mismatch vs bf16 JAX reference"
    assert jnp.allclose(out, ref_f32, atol=3e-2, rtol=3e-2), "mismatch vs f32 JAX reference"
    print("KERNEL_OK")
</pallas_src>

<mosaic_0001>
module attributes {stable_mosaic.version = 11 : i64} {
  func.func @_decode_fc_kernel(%arg0: i32, %arg1: i32, %arg2: i32, %arg3: memref<8x128xf32, #tpu.memory_space<vmem>>, %arg4: memref<128x512xbf16, #tpu.memory_space<vmem>>, %arg5: memref<1x512xf32, #tpu.memory_space<vmem>>, %arg6: memref<512x512xbf16, #tpu.memory_space<vmem>>, %arg7: memref<1x512xf32, #tpu.memory_space<vmem>>, %arg8: memref<8x512xf32, #tpu.memory_space<vmem>>, %arg9: memref<8x512xf32, #tpu.memory_space<vmem>>) attributes {dimension_semantics = [#tpu.dimension_semantics<parallel>, #tpu.dimension_semantics<parallel>, #tpu.dimension_semantics<arbitrary>], iteration_bounds = array<i64: 1, 2, 8>, scalar_prefetch = 0 : i64, scratch_operands = 1 : i64, tpu.core_type = #tpu.core_type<tc>, window_params = [{transform_indices = @transform_0, window_bounds = array<i64: 8, 128>}, {transform_indices = @transform_1, window_bounds = array<i64: 128, 512>}, {transform_indices = @transform_2, window_bounds = array<i64: 1, 512>}, {transform_indices = @transform_3, window_bounds = array<i64: 512, 512>}, {transform_indices = @transform_4, window_bounds = array<i64: 1, 512>}, {transform_indices = @transform_5, window_bounds = array<i64: 8, 512>}]} {
    %c0_i32 = arith.constant 0 : i32
    %0 = arith.cmpi eq, %arg2, %c0_i32 : i32
    %1 = arith.extui %0 : i1 to i32
    %c0_i32_0 = arith.constant 0 : i32
    %2 = arith.cmpi ne, %1, %c0_i32_0 : i32
    scf.if %2 {
      %cst_15 = arith.constant 0.000000e+00 : f32
      %21 = vector.broadcast %cst_15 : f32 to vector<8x512xf32>
      %c0_16 = arith.constant 0 : index
      %c0_17 = arith.constant 0 : index
      %22 = vector.load %arg9[%c0_16, %c0_17] : memref<8x512xf32, #tpu.memory_space<vmem>>, vector<8x512xf32>
      tpu.vector_store %arg9[%c0_16, %c0_17], %21 {strides = array<i32>} : memref<8x512xf32, #tpu.memory_space<vmem>>, vector<8x512xf32>,
    } else {
    }
    %c0 = arith.constant 0 : index
    %c0_1 = arith.constant 0 : index
    %3 = vector.load %arg3[%c0, %c0_1] : memref<8x128xf32, #tpu.memory_space<vmem>>, vector<8x128xf32>
    %4 = arith.truncf %3 : vector<8x128xf32> to vector<8x128xbf16>
    %c0_2 = arith.constant 0 : index
    %c0_3 = arith.constant 0 : index
    %5 = vector.load %arg4[%c0_2, %c0_3] : memref<128x512xbf16, #tpu.memory_space<vmem>>, vector<128x512xbf16>
    %cst = arith.constant dense<0.000000e+00> : vector<8x512xf32>
    %6 = tpu.matmul %4, %5, %cst {dimension_numbers = #tpu.dot_dimension_numbers<[1], [0], [0], [1], [0, 0, 1, 1], [], []>} : vector<8x128xbf16>, vector<128x512xbf16>, vector<8x512xf32> -> vector<8x512xf32>
    %c0_4 = arith.constant 0 : index
    %c0_5 = arith.constant 0 : index
    %7 = vector.load %arg5[%c0_4, %c0_5] : memref<1x512xf32, #tpu.memory_space<vmem>>, vector<1x512xf32>
    %8 = vector.broadcast %7 : vector<1x512xf32> to vector<8x512xf32>
    %9 = arith.addf %6, %8 : vector<8x512xf32>
    %cst_6 = arith.constant 0.000000e+00 : f32
    %10 = vector.broadcast %cst_6 : f32 to vector<8x512xf32>
    %11 = arith.maximumf %9, %10 : vector<8x512xf32>
    %c0_7 = arith.constant 0 : index
    %c0_8 = arith.constant 0 : index
    %12 = vector.load %arg9[%c0_7, %c0_8] : memref<8x512xf32, #tpu.memory_space<vmem>>, vector<8x512xf32>
    %13 = arith.truncf %11 : vector<8x512xf32> to vector<8x512xbf16>
    %c0_9 = arith.constant 0 : index
    %c0_10 = arith.constant 0 : index
    %14 = vector.load %arg6[%c0_9, %c0_10] : memref<512x512xbf16, #tpu.memory_space<vmem>>, vector<512x512xbf16>
    %cst_11 = arith.constant dense<0.000000e+00> : vector<8x512xf32>
    %15 = tpu.matmul %13, %14, %cst_11 {dimension_numbers = #tpu.dot_dimension_numbers<[1], [0], [0], [1], [0, 0, 1, 1], [], []>} : vector<8x512xbf16>, vector<512x512xbf16>, vector<8x512xf32> -> vector<8x512xf32>
    %16 = arith.addf %12, %15 : vector<8x512xf32>
    %c0_12 = arith.constant 0 : index
    %c0_13 = arith.constant 0 : index
    %17 = vector.load %arg9[%c0_12, %c0_13] : memref<8x512xf32, #tpu.memory_space<vmem>>, vector<8x512xf32>
    tpu.vector_store %arg9[%c0_12, %c0_13], %16 {strides = array<i32>} : memref<8x512xf32, #tpu.memory_space<vmem>>, vector<8x512xf32>,
    %c7_i32 = arith.constant 7 : i32
    %18 = arith.cmpi eq, %arg2, %c7_i32 : i32
    %19 = arith.extui %18 : i1 to i32
    %c0_i32_14 = arith.constant 0 : i32
    %20 = arith.cmpi ne, %19, %c0_i32_14 : i32
    scf.if %20 {
      %c0_15 = arith.constant 0 : index
      %c0_16 = arith.constant 0 : index
      %21 = vector.load %arg9[%c0_15, %c0_16] : memref<8x512xf32, #tpu.memory_space<vmem>>, vector<8x512xf32>
      %c0_17 = arith.constant 0 : index
      %c0_18 = arith.constant 0 : index
      %22 = vector.load %arg7[%c0_17, %c0_18] : memref<1x512xf32, #tpu.memory_space<vmem>>, vector<1x512xf32>
      %23 = vector.broadcast %22 : vector<1x512xf32> to vector<8x512xf32>
      %24 = arith.addf %21, %23 : vector<8x512xf32>
      %25 = arith.negf %24 : vector<8x512xf32>
      %26 = math.exp %25 : vector<8x512xf32>
      %cst_19 = arith.constant 1.000000e+00 : f32
      %27 = vector.broadcast %cst_19 : f32 to vector<8x512xf32>
      %28 = arith.addf %27, %26 : vector<8x512xf32>
      %29 = arith.divf %27, %28 : vector<8x512xf32>
      %c0_20 = arith.constant 0 : index
      %c0_21 = arith.constant 0 : index
      %30 = vector.load %arg8[%c0_20, %c0_21] : memref<8x512xf32, #tpu.memory_space<vmem>>, vector<8x512xf32>
      tpu.vector_store %arg8[%c0_20, %c0_21], %29 {strides = array<i32>} : memref<8x512xf32, #tpu.memory_space<vmem>>, vector<8x512xf32>,
    } else {
    }
    return
  }
  func.func @transform_0(%arg0: i32, %arg1: i32, %arg2: i32) -> (i32, i32) {
    %c0_i32 = arith.constant 0 : i32
    %c0_i32_0 = arith.constant 0 : i32
    return %arg0, %c0_i32 : i32, i32
  }
  func.func @transform_1(%arg0: i32, %arg1: i32, %arg2: i32) -> (i32, i32) {
    %c0_i32 = arith.constant 0 : i32
    %c0_i32_0 = arith.constant 0 : i32
    return %c0_i32, %arg2 : i32, i32
  }
  func.func @transform_2(%arg0: i32, %arg1: i32, %arg2: i32) -> (i32, i32) {
    %c0_i32 = arith.constant 0 : i32
    %c0_i32_0 = arith.constant 0 : i32
    return %c0_i32, %arg2 : i32, i32
  }
  func.func @transform_3(%arg0: i32, %arg1: i32, %arg2: i32) -> (i32, i32) {
    %c0_i32 = arith.constant 0 : i32
    return %arg2, %arg1 : i32, i32
  }
  func.func @transform_4(%arg0: i32, %arg1: i32, %arg2: i32) -> (i32, i32) {
    %c0_i32 = arith.constant 0 : i32
    %c0_i32_0 = arith.constant 0 : i32
    return %c0_i32, %arg1 : i32, i32
  }
  func.func @transform_5(%arg0: i32, %arg1: i32, %arg2: i32) -> (i32, i32) {
    %c0_i32 = arith.constant 0 : i32
    return %arg0, %arg1 : i32, i32
  }
}

</mosaic_0001>

<bundles_post_ra>
// kernel: tpu_custom_call.1
= control target key start
LH: loop header
LB: loop body
LE: loop exit
PB: predicated region body
PF: predicated region fallthrough
CT: control target
= control target key end

     0   :  { %s3556_s0 = inlined_call_operand.hbm [shape: f32[8,128], index: 0, kind: input, shape index: {}]   ;;  %s3557_s1 = inlined_call_operand.hbm [shape: bf16[128,4096], index: 1, kind: input, shape index: {}]   ;;  %s3558_s2 = inlined_call_operand.hbm [shape: f32[1,4096], index: 2, kind: input, shape index: {}]   ;;  %s3559_s3 = inlined_call_operand.hbm [shape: bf16[4096,1024], index: 3, kind: input, shape index: {}]   ;;  %s3560_s4 = inlined_call_operand.hbm [shape: f32[1,1024], index: 4, kind: input, shape index: {}]   ;;  %s3561_s5 = inlined_call_operand.hbm [shape: f32[8,1024], index: 5, kind: output, shape index: {}]  }
   0x1   :  { %3581 = sst [smem:[#allocation27_spill]] %s3556_s0 }
   0x2   :  { %3582 = sst [smem:[#allocation28_spill]] %s3557_s1 }
   0x3   :  { %3583 = sst [smem:[#allocation29_spill]] %s3558_s2 }
   0x4   :  { %3584 = sst [smem:[#allocation30_spill]] %s3559_s3 }
   0x5   :  { %3585 = sst [smem:[#allocation31_spill]] %s3560_s4 }
   0x6   :  { %3586 = sst [smem:[#allocation32_spill]] %s3561_s5 }
   0x7   :  { %10 = vsyncpa [#allocation4], 0 }
   0x8   :  { %11 = vsyncpa [#allocation7], 0 }
   0x9   :  { %13 = vsyncpa [#allocation7 + $0x1], 0 }
   0xa   :  { %14 = vsyncpa [#allocation10], 0 }
   0xb   :  { %16 = vsyncpa [#allocation10 + $0x1], 0 }
   0xc   :  { %17 = vsyncpa [#allocation5], 0 }
   0xd   :  { %19 = vsyncpa [#allocation5 + $0x1], 0  ;;  %s2876_s18 = smov 0   ;;  %s2878_s19 = smov 0  }
   0xe   :  { %s2880_s20 = smov 0   ;;  %s2882_s21 = smov 0  }
   0xf   :  { %s2884_s22 = smov 0   ;;  %s2886_s23 = smov 0  }
  0x10   :  { %s2888_s24 = smov 0   ;;  %s2890_s25 = smov 0  }
  0x11   :  { %s2892_s26 = smov 0   ;;  %s2894_s27 = smov 0  }
  0x12   :  { %s2896_s28 = smov 0   ;;  %s2898_s29 = smov 0  }
  0x13   :  { %s2900_s30 = smov 0   ;;  %s2902_s6 = smov 0  }
  0x14 LB: > { %3587 = sst [smem:[#allocation18_spill]] %s2780_s18  ;;  %s37_s7 = sadd.s32 1, %s2824_s29  ;;  %s2832_s6 = sphi %s2902_s6, %s25_s6   ;;  %s2828_s30 = sphi %s2900_s30, %s3661_s30   ;;  %s2824_s29 = sphi %s2898_s29, %s3660_s29   ;;  %s2820_s28 = sphi %s2896_s28, %s3659_s28   ;;  %s2816_s27 = sphi %s2894_s27, %s3658_s27   ;;  %s2812_s26 = sphi %s2892_s26, %s3657_s26   ;;  %s2808_s25 = sphi %s2890_s25, %s3656_s25   ;;  %s2804_s24 = sphi %s2888_s24, %s3655_s24   ;;  %s2800_s23 = sphi %s2886_s23, %s3654_s23   ;;  %s2796_s22 = sphi %s2884_s22, %s3653_s22   ;;  %s2792_s21 = sphi %s2882_s21, %s3652_s21   ;;  %s2788_s20 = sphi %s2880_s20, %s3651_s20   ;;  %s2784_s19 = sphi %s2878_s19, %s3648_s19   ;;  %s2780_s18 = sphi %s2876_s18, %s3647_s18  }
  0x15   : > { %3588 = sst [smem:[#allocation19_spill]] %s2784_s19  ;;  %s77_s8 = sadd.s32 1, %s2812_s26 }
  0x16   : > { %3589 = sst [smem:[#allocation20_spill]] %s2788_s20  ;;  %p2948_p0 = scmp.ge.s32.totalorder %s37_s7, 8 }
  0x17   : > { %3590 = sst [smem:[#allocation21_spill]] %s2816_s27  ;;  %p84_p1 = scmp.ne.s32.totalorder %s2812_s26, %s2808_s25 }
  0x18   : > { %3591 = sst [smem:[#allocation22_spill]] %s2820_s28  ;;  %p3566_p2 = scmp.eq.s32.totalorder %s2832_s6, 0 }
  0x19   : > { %s3592_s9 = scalar_select %p2948_p0, 1, 0 }
  0x1a   : > { %s3663_s7 = smov (%p2948_p0, %s37_s7), 0  ;;  %p86_p3 = por %p3566_p2, %p84_p1 }
  0x1b   : > { %3593 = sst [smem:[#allocation23_spill]] %s3592_s9  ;;  %p3565_p4 = scmp.lt.s32.totalorder %s2832_s6, 16 }
  0x1c   : > { %3594 = sst [smem:[#allocation24_spill]] %s3663_s7  ;;  %s2964_s10 = ssub.s32 %s2824_s29, %s3663_s7 }
  0x1d   : > { %3595 = sst [smem:[#allocation25_spill]] %s2964_s10  ;;  %p75_p5 = scmp.eq.s32.totalorder %s2964_s10, 0 }
  0x1e   : > { %s3564_s12 = sand.u32 1, %s2812_s26   ;;  %s2107_s13 = sshll.u32 %s2824_s29, 8 }
  0x1f   : > { %s2971_s14 = scalar_select %p75_p5, %s2812_s26, %s77_s8  }
  0x20   : > { %s1915_s15 = sshll.u32 %s3564_s12, 8  ;;  %s3597_s1 = sld [smem:[#allocation28_spill]] }
  0x21   : > { %3596 = sst [smem:[#allocation26_spill]] %s2971_s14  ;;  %p2982_p6 = pnand %p3565_p4, %p86_p3 }
  0x22   : > { %s239_s8 = scalar_lea.vmem [#allocation6], %s1915_s15  ;;  %s3599_s12 = sand.u32 1, %s2832_s6  }
  0x23   : > { %s246_s11 = sshll.u32 %s239_s8, 4  ;;  %s2990_s14 = scalar_lea.sflag [#allocation7], %s3599_s12  ;;  %s2986_s11 = int_to_ptr.vmem [resolvable:$true] %s246_s11 }
  0x24   : > { %p3572_p8 = pneg %p2982_p6 }
  0x26   : > { %s2978_s5 = scalar_lea.hbm %s3597_s1, %s2107_s13  ;;  %s2531_s28 = scalar_lea.hbm %s3597_s1, 32768 }
  0x27   : > { %s2526_s13 = scalar_lea.hbm %s2978_s5, 4096  ;;  %p2532_p11 = scmp.lt.u32.totalorder %s2978_s5, %s3597_s1 }
  0x28   : > { %p2527_p7 = scmp.ne.s32.totalorder %s2978_s5, %s2526_s13  ;;  %p2533_p12 = scmp.lt.u32.totalorder %s2531_s28, %s2526_s13 }
  0x29   : > { %p2535_p1 = scmp.lt.u32.totalorder %s2526_s13, %s2978_s5 }
  0x2a   : > { %p2529_p9 = pnand %p3572_p8, %p2527_p7  ;;  %p2534_p13 = por %p2533_p12, %p2532_p11 }
  0x2c   : > { %p2530_p10 = pneg %p2529_p9  ;;  %p2536_p3 = por %p2535_p1, %p2534_p13 }
  0x2e   : > { %p2537_p5 = pnand %p2536_p3, %p2530_p10 }
  0x30   : > { %2540 = shalt.err (!%p2537_p5)
}
  0x31   : > { %s2541_s12 = scalar_lea.vmem %s2986_s11, 4096  ;;  %s2834_s8 = smov [#allocation6]  }
  0x32   : > { %p2542_p7 = scmp.ne.s32.totalorder %s2986_s11, %s2541_s12  ;;  %s2546_s16 = sshll.u32 %s2834_s8, 4  ;;  %s2547_s16 = int_to_ptr.vmem [resolvable:$false] %s2546_s16 }
  0x33   : > { %s2548_s27 = scalar_lea.vmem %s2547_s16, 8192  ;;  %p2549_p2 = scmp.lt.s32.totalorder %s2986_s11, %s2547_s16 }
  0x34   : > { %p2544_p9 = pnand %p2542_p7, %p3572_p8  ;;  %p2550_p11 = scmp.lt.s32.totalorder %s2548_s27, %s2541_s12 }
  0x36   : > { %p2545_p4 = pneg %p2544_p9  ;;  %p2551_p12 = por %p2550_p11, %p2549_p2 }
  0x38   : > { %p2552_p13 = pnand %p2551_p12, %p2545_p4 }
  0x3a   : > { %2555 = shalt.err (!%p2552_p13)
}
  0x3b   : > { %s2835_s28 = smov 2048   ;;  %s2836_s13 = smov 256  }
  0x3c   : > { %s2837_s17 = smov 16   ;;  %s40_s15 = sadd.s32 1, %s2828_s30 }
  0x3d   : > { %2133 = dma.hbm_to_vmem [thread:$0]  (!%p2982_p6), %s2978_s5, 4096, %s2986_s11, %s2990_s14, %s2835_s28, %s2836_s13, %s2837_s17  }
  0x3e   : > { %p138_p2 = scmp.ne.s32.totalorder %s2800_s23, %s2796_s22  ;;  %s277_s8 = sand.u32 1, %s2800_s23  }
  0x3f   : > { %s1923_s16 = sshll.u32 %s2828_s30, 2  ;;  %p3600_p4 = scmp.eq.s32.totalorder %s2832_s6, 0 }
  0x40   : > { %s1921_s27 = sshll.u32 %s277_s8, 10  ;;  %s2109_s1 = sshll.u32 %s2824_s29, 9 }
  0x41   : > { %p140_p10 = por %p138_p2, %p3600_p4  ;;  %s286_s4 = sadd.s32 %s2109_s1, %s1923_s16 }
  0x42   : > { %s279_s10 = scalar_lea.vmem [#allocation9], %s1921_s27  ;;  %s1925_s19 = sshll.u32 %s286_s4, 6 }
  0x43   : > { %s289_s18 = sshll.u32 %s279_s10, 4  ;;  %s3601_s3 = sld [smem:[#allocation30_spill]]  ;;  %s3029_s18 = int_to_ptr.vmem [resolvable:$true] %s289_s18 }
  0x44   : > { %p3602_p1 = scmp.lt.s32.totalorder %s2832_s6, 16  ;;  %s3604_s1 = sand.u32 1, %s2832_s6  }
  0x45   : > { %s3044_s4 = scalar_lea.sflag [#allocation10], %s3604_s1 }
  0x46   : > { %p3038_p3 = pnand %p3602_p1, %p140_p10 }
  0x48   : > { %p2558_p7 = pneg %p3038_p3 }
  0x49   : > { %s3034_s5 = scalar_lea.hbm %s3601_s3, %s1925_s19  ;;  %s2561_s9 = scalar_lea.hbm %s3601_s3, 262144 }
  0x4a   : > { %s2556_s10 = scalar_lea.hbm %s3034_s5, 16384  ;;  %p2562_p12 = scmp.lt.u32.totalorder %s3034_s5, %s3601_s3 }
  0x4b   : > { %p2557_p5 = scmp.ne.s32.totalorder %s3034_s5, %s2556_s10  ;;  %p2563_p13 = scmp.lt.u32.totalorder %s2561_s9, %s2556_s10 }
  0x4c   : > { %p2565_p4 = scmp.lt.u32.totalorder %s2556_s10, %s3034_s5 }
  0x4d   : > { %p2559_p9 = pnand %p2558_p7, %p2557_p5  ;;  %p2564_p2 = por %p2563_p13, %p2562_p12 }
  0x4f   : > { %p2560_p11 = pneg %p2559_p9  ;;  %p2566_p10 = por %p2565_p4, %p2564_p2 }
  0x51   : > { %p2567_p1 = pnand %p2566_p10, %p2560_p11 }
  0x53   : > { %2570 = shalt.err (!%p2567_p1)
}
  0x54   : > { %s2571_s16 = scalar_lea.vmem %s3029_s18, 16384  ;;  %s2838_s27 = smov [#allocation9]  }
  0x55   : > { %p2572_p5 = scmp.ne.s32.totalorder %s3029_s18, %s2571_s16  ;;  %s2576_s1 = sshll.u32 %s2838_s27, 4  ;;  %s2577_s1 = int_to_ptr.vmem [resolvable:$false] %s2576_s1 }
  0x56   : > { %s2578_s19 = scalar_lea.vmem %s2577_s1, 32768  ;;  %p2579_p0 = scmp.lt.s32.totalorder %s3029_s18, %s2577_s1 }
  0x57   : > { %p2574_p9 = pnand %p2572_p5, %p2558_p7  ;;  %p2580_p12 = scmp.lt.s32.totalorder %s2578_s19, %s2571_s16 }
  0x59   : > { %p2575_p8 = pneg %p2574_p9  ;;  %p2581_p13 = por %p2580_p12, %p2579_p0 }
  0x5b   : > { %p2582_p2 = pnand %p2581_p13, %p2575_p8 }
  0x5d   : > { %2585 = shalt.err (!%p2582_p2)
}
  0x5e   : > { %s2839_s10 = smov 512   ;;  %s3075_s20 = sadd.s32 4294967295, %s2832_s6  }
  0x5f   : > { %2139 = dma.hbm_to_vmem [thread:$0]  (!%p3038_p3), %s3034_s5, 16384, %s3029_s18, %s3044_s4, %s2839_s10, %s2836_s13, %s2837_s17  }
  0x60   : > { %p90_p0 = scmp.ne.s32.totalorder %s2808_s25, %s2804_s24  ;;  %p3574_p8 = scmp.eq.s32.totalorder %s3075_s20, 0 }
  0x61   : > { %p144_p7 = scmp.ne.s32.totalorder %s2796_s22, %s2792_s21  ;;  %p1912_p4 = scmp.ge.s32.totalorder %s2832_s6, 1 }
  0x62   : > { %p3086_p10 = por %p3574_p8, %p90_p0  ;;  %p209_p1 = scmp.lt.s32.totalorder %s2832_s6, 17 }
  0x63   : > { %p3092_p3 = por %p144_p7, %p3574_p8  ;;  %s3607_s13 = sand.u32 1, %s2812_s26  }
  0x64   : > { %s3605_s11 = scalar_select %p3086_p10, 1, 0 }
  0x65   : > { %s3606_s18 = scalar_select %p3092_p3, 1, 0 }
  0x66   : > { %s1918_s17 = sshll.u32 %s3607_s13, 2  ;;  %p3099_p5 = pnand %p1912_p4, %p209_p1 }
  0x67   : > { %s2840_s21 = smov [#allocation3]   ;;  %s2108_s9 = sshll.u32 %s2824_s29, 6 }
  0x68   : > { %s3608_s24 = scalar_select %p3099_p5, 1, 0 }
  0x69   : > { %s224_s5 = sshll.u32 %s2840_s21, 4  ;;  %p2126_p9 = pneg %p3099_p5  ;;  %s3103_s5 = int_to_ptr.vmem [resolvable:$true] %s224_s5 }
  0x6a   : > { %s3609_s2 = sld [smem:[#allocation29_spill]]  ;;  %s260_s27 = scalar_lea.vmem [#allocation8], %s1918_s17 }
  0x6b   : > { %s268_s1 = sshll.u32 %s260_s27, 4  ;;  %p3115_p12 = pnand %p2126_p9, %p3574_p8  ;;  %s269_s1 = int_to_ptr.vmem [resolvable:$true] %s268_s1 }
  0x6c   : > { %p3611_p2 = pneg %p2982_p6 }
  0x6d   : > { %s3610_s19 = scalar_select %p3115_p12, 1, 0 }
  0x70   : > { %s3111_s16 = scalar_lea.hbm %s3609_s2, %s2108_s9  ;;  %s2591_s9 = scalar_lea.hbm %s3609_s2, 512 }
  0x71   : > { %s2586_s10 = scalar_lea.hbm %s3111_s16, 64  ;;  %p2592_p4 = scmp.lt.u32.totalorder %s3111_s16, %s3609_s2 }
  0x72   : > { %p2587_p13 = scmp.ne.s32.totalorder %s3111_s16, %s2586_s10  ;;  %p2593_p1 = scmp.lt.u32.totalorder %s2591_s9, %s2586_s10 }
  0x73   : > { %p2595_p8 = scmp.lt.u32.totalorder %s2586_s10, %s3111_s16 }
  0x74   : > { %p2589_p0 = pnand %p2587_p13, %p3611_p2  ;;  %p2594_p9 = por %p2593_p1, %p2592_p4 }
  0x76   : > { %p2590_p7 = pneg %p2589_p0  ;;  %p2596_p11 = por %p2595_p8, %p2594_p9 }
  0x78   : > { %p2597_p3 = pnand %p2596_p11, %p2590_p7 }
  0x7a   : > { %2600 = shalt.err (!%p2597_p3)
}
  0x7b   : > { %s2601_s17 = scalar_lea.vmem %s269_s1, 64  ;;  %p3612_p13 = pmov %p3611_p2 }
  0x7c   : > { %p2602_p10 = scmp.ne.s32.totalorder %s269_s1, %s2601_s17  ;;  %s2841_s27 = smov [#allocation8]  }
  0x7d   : > { %s2606_s13 = sshll.u32 %s2841_s27, 4  ;;  %s2607_s13 = int_to_ptr.vmem [resolvable:$false] %s2606_s13 }
  0x7e   : > { %p2604_p2 = pnand %p2602_p10, %p3612_p13  ;;  %s2608_s21 = scalar_lea.vmem %s2607_s13, 128 }
  0x7f   : > { %p2609_p5 = scmp.lt.s32.totalorder %s269_s1, %s2607_s13  ;;  %p2610_p12 = scmp.lt.s32.totalorder %s2608_s21, %s2601_s17 }
  0x80   : > { %p2605_p0 = pneg %p2604_p2 }
  0x81   : > { %p2611_p1 = por %p2610_p12, %p2609_p5 }
  0x83   : > { %p2612_p4 = pnand %p2611_p1, %p2605_p0 }
  0x85   : > { %2615 = shalt.err (!%p2612_p4)
}
  0x86   : > { %2136 = dma.hbm_to_vmem [thread:$0]  (!%p2982_p6), %s3111_s16, 64, %s269_s1, %s2990_s14  }
  0x87   : > { %s3613_s0 = sld [smem:[#allocation27_spill]]  ;;  %p3614_p11 = scmp.ne.s32.totalorder %s3610_s19, 0 }
  0x89   : > { %p2618_p10 = pneg %p3614_p11 }
  0x8d   : > { %s2616_s28 = scalar_lea.hbm %s3613_s0, 128 }
  0x8e   : > { %p2617_p8 = scmp.ne.s32.totalorder %s3613_s0, %s2616_s28  ;;  %p2623_p12 = scmp.lt.u32.totalorder %s2616_s28, %s3613_s0 }
  0x90   : > { %p2619_p3 = pnand %p2618_p10, %p2617_p8 }
  0x92   : > { %p2620_p5 = pneg %p2619_p3 }
  0x94   : > { %p2625_p7 = pnand %p2623_p12, %p2620_p5 }
  0x96   : > { %2628 = shalt.err (!%p2625_p7)
}
  0x97   : > { %s2629_s7 = scalar_lea.vmem %s3103_s5, 128  ;;  %p2637_p2 = scmp.lt.s32.totalorder %s3103_s5, %s3103_s5 }
  0x98   : > { %p2630_p6 = scmp.ne.s32.totalorder %s3103_s5, %s2629_s7  ;;  %p2638_p0 = scmp.lt.s32.totalorder %s2629_s7, %s2629_s7 }
  0x9a   : > { %p2632_p9 = pnand %p2630_p6, %p2618_p10  ;;  %p2639_p1 = por %p2638_p0, %p2637_p2 }
  0x9c   : > { %p2633_p13 = pneg %p2632_p9 }
  0x9e   : > { %p2640_p4 = pnand %p2639_p1, %p2633_p13 }
  0xa0   : > { %2643 = shalt.err (!%p2640_p4)
}
  0xa1   : > { %s3615_s16 = sld [smem:[#allocation23_spill]]  ;;  %s3616_s1 = sld [smem:[#allocation20_spill]] }
  0xa2   : > { %s3617_s13 = sld [smem:[#allocation19_spill]]  ;;  %s3618_s21 = sld [smem:[#allocation18_spill]] }
  0xa3   : > { %s3619_s10 = sld [smem:[#allocation25_spill]]  ;;  %s1911_s19 = sadd.s32 4294967294, %s2832_s6  }
  0xa4   : > { %2129 = dma.hbm_to_vmem [thread:$0]  (!%p3614_p11), %s3613_s0, 128, %s3103_s5, [#allocation4]  }
  0xa5   : > { %p3621_p12 = scmp.eq.s32.totalorder %s2832_s6, 0  ;;  %p3623_p6 = scmp.eq.s32.totalorder %s3075_s20, 15 }
  0xa6   : > { %p3625_p11 = scmp.eq.s32.totalorder %s3075_s20, 0  ;;  %p202_p2 = scmp.eq.s32.totalorder %s1911_s19, 15 }
  0xa7   : > { %p3620_p8 = scmp.ne.s32.totalorder %s3615_s16, 0  ;;  %s157_s9 = sadd.s32 1, %s3616_s1 }
  0xa8   : > { %p164_p10 = scmp.ne.s32.totalorder %s3616_s1, %s3617_s13  ;;  %p170_p5 = scmp.ne.s32.totalorder %s3617_s13, %s3618_s21 }
  0xa9   : > { %s3665_s15 = smov (!%p3620_p8, %s40_s15), %s2828_s30  ;;  %s301_s27 = sand.u32 1, %s3616_s1  }
  0xaa   : > { %p42_p3 = scmp.ge.s32.totalorder %s3665_s15, 2  ;;  %p3173_p7 = por %p164_p10, %p3621_p12 }
  0xab   : > { %p3179_p9 = por %p3623_p6, %p164_p10  ;;  %p3187_p13 = por %p170_p5, %p3625_p11 }
  0xac   : > { %s3667_s15 = smov (%p42_p3, %s3665_s15), 0  ;;  %p3195_p4 = por %p202_p2, %p170_p5 }
  0xad   : > { %s3624_s5 = scalar_select %p3179_p9, 1, 0 }
  0xae   : > { %s3626_s8 = scalar_select %p3187_p13, 1, 0 }
  0xaf   : > { %s127_s17 = ssub.s32 %s2828_s30, %s3667_s15  ;;  %s3628_s12 = sadd.s32 1, %s2800_s23 }
  0xb0   : > { %s128_s7 = sor.u32 %s127_s17, %s3619_s10  ;;  %p155_p0 = scmp.eq.s32.totalorder %s127_s17, 0 }
  0xb1   : > { %p129_p1 = scmp.eq.s32.totalorder %s128_s7, 0  ;;  %s1926_s13 = sshll.u32 %s301_s27, 2 }
  0xb2   : > { %s3627_s14 = scalar_select %p3195_p4, 1, 0 }
  0xb3   : > { %s3669_s1 = smov (!%p155_p0, %s3616_s1), %s157_s9  ;;  %s2110_s21 = sshll.u32 %s2828_s30, 6 }
  0xb4   : > { %s3205_s16 = scalar_select %p129_p1, %s2800_s23, %s3628_s12  }
  0xb5   : > { %s3629_s3 = sld [smem:[#allocation31_spill]]  ;;  %s303_s10 = scalar_lea.vmem [#allocation11], %s1926_s13 }
  0xb6   : > { %s311_s17 = sshll.u32 %s303_s10, 4  ;;  %p3630_p8 = scmp.lt.s32.totalorder %s2832_s6, 16  ;;  %s312_s17 = int_to_ptr.vmem [resolvable:$true] %s311_s17 }
  0xb8   : > { %p3217_p10 = pnand %p3630_p8, %p3173_p7 }
  0xba   : > { %p2646_p5 = pneg %p3217_p10 }
  0xbb   : > { %s3211_s19 = scalar_lea.hbm %s3629_s3, %s2110_s21  ;;  %s2649_s28 = scalar_lea.hbm %s3629_s3, 128 }
  0xbc   : > { %s2644_s27 = scalar_lea.hbm %s3211_s19, 64  ;;  %p2650_p7 = scmp.lt.u32.totalorder %s3211_s19, %s3629_s3 }
  0xbd   : > { %p2645_p3 = scmp.ne.s32.totalorder %s3211_s19, %s2644_s27  ;;  %p2651_p11 = scmp.lt.u32.totalorder %s2649_s28, %s2644_s27 }
  0xbe   : > { %p2653_p0 = scmp.lt.u32.totalorder %s2644_s27, %s3211_s19 }
  0xbf   : > { %p2647_p12 = pnand %p2646_p5, %p2645_p3  ;;  %p2652_p2 = por %p2651_p11, %p2650_p7 }
  0xc1   : > { %p2648_p6 = pneg %p2647_p12  ;;  %p2654_p1 = por %p2653_p0, %p2652_p2 }
  0xc3   : > { %p2655_p8 = pnand %p2654_p1, %p2648_p6 }
  0xc5   : > { %2658 = shalt.err (!%p2655_p8)
}
  0xc6   : > { %s2659_s13 = scalar_lea.vmem %s312_s17, 64  ;;  %s2842_s21 = smov [#allocation11]  }
  0xc7   : > { %p2660_p4 = scmp.ne.s32.totalorder %s312_s17, %s2659_s13  ;;  %s2664_s10 = sshll.u32 %s2842_s21, 4  ;;  %s2665_s10 = int_to_ptr.vmem [resolvable:$false] %s2664_s10 }
  0xc8   : > { %s2666_s0 = scalar_lea.vmem %s2665_s10, 128  ;;  %p2667_p9 = scmp.lt.s32.totalorder %s312_s17, %s2665_s10 }
  0xc9   : > { %p2662_p3 = pnand %p2660_p4, %p2646_p5  ;;  %p2668_p13 = scmp.lt.s32.totalorder %s2666_s0, %s2659_s13 }
  0xcb   : > { %p2663_p12 = pneg %p2662_p3  ;;  %p2669_p7 = por %p2668_p13, %p2667_p9 }
  0xcd   : > { %p2670_p11 = pnand %p2669_p7, %p2663_p12 }
  0xcf   : > { %2673 = shalt.err (!%p2670_p11)
}
  0xd0   : > { %2142 = dma.hbm_to_vmem [thread:$0]  (!%p3217_p10), %s3211_s19, 64, %s312_s17, %s3044_s4  }
  0xd1   : > { %p3632_p6 = scmp.ne.s32.totalorder %s3608_s24, 0 }
  0xd2   : > { %p3633_p4 = scmp.eq.s32.totalorder (!%p3632_p6), %s3075_s20, 0 }
  0xd3   : > { %320 = sbr.rel (%p3632_p6) target bundleno = 854 (0x356), region = 40 }
  0xda   : > { %2759 = dma.done.wait (%p3633_p4), [#allocation4], 128   ;;  %p3634_p5 = pmov %p3633_p4 }
  0xdb   : > { %s326_s27 = sand.u32 1, %s3075_s20   ;;  %s328_s2 = sand.u32 1, %s2808_s25  }
  0xdc   : > { %2761 = vsyncadd (%p3634_p5), [#allocation4], 4294967168  ;;  %s1931_s28 = sshll.u32 %s328_s2, 8  ;;  %s327_s7 = scalar_lea.sflag [#allocation7], %s326_s27 }
  0xdd   : > { %s3251_s9 = scalar_lea.vmem [#allocation6], %s1931_s28  ;;  %p3635_p9 = scmp.ne.s32.totalorder %s3605_s11, 0 }
  0xdf   : > { %2763 = dma.done.wait (%p3635_p9), %s327_s7, 4160  }
  0xe0   : > { %2765 = vsyncadd (%p3635_p9), %s327_s7, 4294963136  ;;  %s3257_s4 = sshll.u32 %s328_s2, 2  ;;  %s346_s24 = sand.u32 1, %s2796_s22  }
  0xe1   : > { %s1933_s19 = sshll.u32 %s346_s24, 10  ;;  %s339_s17 = scalar_lea.vmem [#allocation8], %s3257_s4 }
  0xe2   : > { %s345_s12 = scalar_lea.sflag [#allocation10], %s326_s27  ;;  %s3261_s20 = scalar_lea.vmem [#allocation9], %s1933_s19 }
  0xe3   : > { %p3636_p13 = scmp.ne.s32.totalorder %s3606_s18, 0 }
  0xe5   : > { %2767 = dma.done.wait (%p3636_p13), %s345_s12, 16384  }
  0xe6   : > { %2769 = vsyncadd (%p3636_p13), %s345_s12, 4294950912  ;;  %s3637_s13 = sld [smem:[#allocation19_spill]]  ;;  %p3638_p10 = scmp.ne.s32.totalorder %s3626_s8, 0 }
  0xec   : > { %s3268_s11 = sand.u32 1, %s3637_s13  }
  0xed   : > { %s1934_s21 = sshll.u32 %s3268_s11, 2 }
  0xee   : > { %s3271_s10 = scalar_lea.vmem [#allocation11], %s1934_s21 }
  0xef   : > { %2771 = dma.done.wait (%p3638_p10), %s345_s12, 64  }
  0xf0   : > { %2773 = vsyncadd (%p3638_p10), %s345_s12, 4294967232  ;;  %s1935_s0 = sshll.u32 %s3268_s11, 5  ;;  %s3639_s2 = sld [smem:[#allocation21_spill]] }
  0xf1   : > { %s3278_s27 = scalar_lea.vmem [#allocation12], %s1935_s0 }
  0xf6   : > { %p1936_p2 = scmp.ne.s32.totalorder %s3639_s2, 0 }
  0xf7   : > { %v2843_v0 = vmov (!%p1936_p2), 0.0  }
  0xf8   : > { %409 = sbr.rel (%p1936_p2) target bundleno = 255 (0xff), region = 64  ;;  %410 = vst [vmem:[#allocation2] sm:$0xff] (!%p1936_p2), %v2843_v0  ;;  %411 = vst [vmem:[#allocation2 + $0x8] sm:$0xff] (!%p1936_p2), %v2843_v0 }
  0xf9   : > { %412 = vst [vmem:[#allocation2 + $0x10] sm:$0xff] (!%p1936_p2), %v2843_v0  ;;  %413 = vst [vmem:[#allocation2 + $0x18] sm:$0xff] (!%p1936_p2), %v2843_v0 }
  0xff PF: > { %v2270_v1 = vld [vmem:[%s3251_s9 + $0x4] ss:$16 sps:$4 sm:$0xff]   ;;  %v2272_v2 = vld [vmem:[%s3251_s9 + $0xc] ss:$16 sps:$4 sm:$0xff]   ;;  %v2844_v3 = vmov 0   ;;  %s3640_s18 = sld [smem:[#allocation21_spill]] }
 0x100   : > { %662 = vmatprep.mubr.bf16.mxu0 %v2844_v3  ;;  %703 = vmatprep.mubr.bf16.mxu1 %v2844_v3  ;;  %v2274_v4 = vld [vmem:[%s3251_s9] ss:$16 sps:$4 sm:$0xff]   ;;  %v2275_v5 = vld [vmem:[%s3251_s9 + $0x8] ss:$16 sps:$4 sm:$0xff]   ;;  %v2276_v6 = vld [vmem:[%s3251_s9 + $0x24] ss:$16 sps:$4 sm:$0xff]  }
 0x101   : > { %630 = vmatprep.subr.bf16.mxu0 %v2270_v1  ;;  %671 = vmatprep.subr.bf16.mxu1 %v2272_v2  ;;  %v2278_v7 = vld [vmem:[%s3251_s9 + $0x2c] ss:$16 sps:$4 sm:$0xff]   ;;  %v2280_v8 = vld [vmem:[%s3251_s9 + $0x20] ss:$16 sps:$4 sm:$0xff]   ;;  %v2281_v9 = vld [vmem:[%s3251_s9 + $0x28] ss:$16 sps:$4 sm:$0xff]  }
 0x102   : > { %631 = vmatpush1.bf16.msra.mxu0 %v2274_v4  ;;  %672 = vmatpush1.bf16.msra.mxu1 %v2275_v5  ;;  %v2282_v10 = vld [vmem:[%s3251_s9 + $0x44] ss:$16 sps:$4 sm:$0xff]   ;;  %v2284_v11 = vld [vmem:[%s3251_s9 + $0x4c] ss:$16 sps:$4 sm:$0xff]   ;;  %v2286_v12 = vld [vmem:[%s3251_s9 + $0x40] ss:$16 sps:$4 sm:$0xff]  }
 0x103   : > { %632 = vmatprep.subr.bf16.mxu0 %v2276_v6  ;;  %673 = vmatprep.subr.bf16.mxu1 %v2278_v7  ;;  %v2287_v13 = vld [vmem:[%s3251_s9 + $0x48] ss:$16 sps:$4 sm:$0xff]   ;;  %v2288_v14 = vld [vmem:[%s3251_s9 + $0x64] ss:$16 sps:$4 sm:$0xff]   ;;  %v2290_v15 = vld [vmem:[%s3251_s9 + $0x6c] ss:$16 sps:$4 sm:$0xff]  }
 0x104   : > { %v2292_v16 = vld [vmem:[%s3251_s9 + $0x60] ss:$16 sps:$4 sm:$0xff]   ;;  %v2293_v17 = vld [vmem:[%s3251_s9 + $0x68] ss:$16 sps:$4 sm:$0xff]   ;;  %v2294_v18 = vld [vmem:[%s3251_s9 + $0x84] ss:$16 sps:$4 sm:$0xff]  }
 0x105   : > { %v2296_v19 = vld [vmem:[%s3251_s9 + $0x8c] ss:$16 sps:$4 sm:$0xff]   ;;  %v2298_v20 = vld [vmem:[%s3251_s9 + $0x80] ss:$16 sps:$4 sm:$0xff]   ;;  %v2299_v21 = vld [vmem:[%s3251_s9 + $0x88] ss:$16 sps:$4 sm:$0xff]  }
 0x106   : > { %633 = vmatpush1.bf16.msra.mxu0 %v2280_v8  ;;  %674 = vmatpush1.bf16.msra.mxu1 %v2281_v9  ;;  %v2300_v22 = vld [vmem:[%s3251_s9 + $0xa4] ss:$16 sps:$4 sm:$0xff]   ;;  %v2302_v23 = vld [vmem:[%s3251_s9 + $0xac] ss:$16 sps:$4 sm:$0xff]   ;;  %v2304_v24 = vld [vmem:[%s3251_s9 + $0xa0] ss:$16 sps:$4 sm:$0xff]  }
 0x107   : > { %634 = vmatprep.subr.bf16.mxu0 %v2282_v10  ;;  %675 = vmatprep.subr.bf16.mxu1 %v2284_v11  ;;  %v2305_v25 = vld [vmem:[%s3251_s9 + $0xa8] ss:$16 sps:$4 sm:$0xff]   ;;  %v2306_v26 = vld [vmem:[%s3251_s9 + $0xc4] ss:$16 sps:$4 sm:$0xff]   ;;  %v2308_v27 = vld [vmem:[%s3251_s9 + $0xcc] ss:$16 sps:$4 sm:$0xff]  }
 0x108   : > { %v2310_v28 = vld [vmem:[%s3251_s9 + $0xc0] ss:$16 sps:$4 sm:$0xff]   ;;  %v2311_v29 = vld [vmem:[%s3251_s9 + $0xc8] ss:$16 sps:$4 sm:$0xff]   ;;  %v2312_v30 = vld [vmem:[%s3251_s9 + $0xe4] ss:$16 sps:$4 sm:$0xff]  }
 0x109   : > { %v2314_v31 = vld [vmem:[%s3251_s9 + $0xec] ss:$16 sps:$4 sm:$0xff]   ;;  %v2316_v32 = vld [vmem:[%s3251_s9 + $0xe0] ss:$16 sps:$4 sm:$0xff]   ;;  %v2317_v33 = vld [vmem:[%s3251_s9 + $0xe8] ss:$16 sps:$4 sm:$0xff]  }
 0x10a   : > { %635 = vmatpush1.bf16.msra.mxu0 %v2286_v12  ;;  %676 = vmatpush1.bf16.msra.mxu1 %v2287_v13  ;;  %v414_v34 = vld [vmem:[#allocation3] sm:$0xff]  ;;  %p2097_p0 = scmp.ne.s32.totalorder %s3640_s18, 7 }
 0x10b   : > { %636 = vmatprep.subr.bf16.mxu0 %v2288_v14  ;;  %677 = vmatprep.subr.bf16.mxu1 %v2290_v15  ;;  %v2320_v35 = vld [vmem:[%s3261_s20 + $0x4] ss:$16 sps:$4 sm:$0xff]   ;;  %v415_v37 = vpack.c.bf16 %v414_v34, %v414_v34  ;;  %v2318_v38 = vld [vmem:[%s3261_s20] ss:$16 sps:$4 sm:$0xff]  }
 0x10c   : > { %v2323_v36 = vld [vmem:[%s3261_s20 + $0x204] ss:$16 sps:$4 sm:$0xff]   ;;  %v2321_v39 = vld [vmem:[%s3261_s20 + $0x200] ss:$16 sps:$4 sm:$0xff]  }
 0x10d   : > { %v2326_v40 = vld [vmem:[%s3261_s20 + $0x24] ss:$16 sps:$4 sm:$0xff]   ;;  %v2324_v42 = vld [vmem:[%s3261_s20 + $0x20] ss:$16 sps:$4 sm:$0xff]  }
 0x10e   : > { %637 = vmatpush1.bf16.msra.mxu0 %v2292_v16  ;;  %678 = vmatpush1.bf16.msra.mxu1 %v2293_v17  ;;  %v2329_v41 = vld [vmem:[%s3261_s20 + $0x224] ss:$16 sps:$4 sm:$0xff]   ;;  %v2327_v43 = vld [vmem:[%s3261_s20 + $0x220] ss:$16 sps:$4 sm:$0xff]  }
 0x10f   : > { %638 = vmatprep.subr.bf16.mxu0 %v2294_v18  ;;  %679 = vmatprep.subr.bf16.mxu1 %v2296_v19  ;;  %v2332_v44 = vld [vmem:[%s3261_s20 + $0x44] ss:$16 sps:$4 sm:$0xff]   ;;  %v2330_v46 = vld [vmem:[%s3261_s20 + $0x40] ss:$16 sps:$4 sm:$0xff]  }
 0x110   : > { %v2335_v45 = vld [vmem:[%s3261_s20 + $0x244] ss:$16 sps:$4 sm:$0xff]   ;;  %v2333_v47 = vld [vmem:[%s3261_s20 + $0x240] ss:$16 sps:$4 sm:$0xff]  }
 0x111   : > { %v2338_v48 = vld [vmem:[%s3261_s20 + $0x64] ss:$16 sps:$4 sm:$0xff]   ;;  %v2336_v50 = vld [vmem:[%s3261_s20 + $0x60] ss:$16 sps:$4 sm:$0xff]  }
 0x112   : > { %639 = vmatpush1.bf16.msra.mxu0 %v2298_v20  ;;  %680 = vmatpush1.bf16.msra.mxu1 %v2299_v21  ;;  %v2341_v49 = vld [vmem:[%s3261_s20 + $0x264] ss:$16 sps:$4 sm:$0xff]   ;;  %v2339_v51 = vld [vmem:[%s3261_s20 + $0x260] ss:$16 sps:$4 sm:$0xff]  }
 0x113   : > { %640 = vmatprep.subr.bf16.mxu0 %v2300_v22  ;;  %681 = vmatprep.subr.bf16.mxu1 %v2302_v23  ;;  %v2344_v52 = vld [vmem:[%s3261_s20 + $0x84] ss:$16 sps:$4 sm:$0xff]   ;;  %v2342_v54 = vld [vmem:[%s3261_s20 + $0x80] ss:$16 sps:$4 sm:$0xff]  }
 0x114   : > { %v2347_v53 = vld [vmem:[%s3261_s20 + $0x284] ss:$16 sps:$4 sm:$0xff]   ;;  %v2345_v55 = vld [vmem:[%s3261_s20 + $0x280] ss:$16 sps:$4 sm:$0xff]  }
 0x115   : > { %v2350_v56 = vld [vmem:[%s3261_s20 + $0xa4] ss:$16 sps:$4 sm:$0xff]   ;;  %v2348_v58 = vld [vmem:[%s3261_s20 + $0xa0] ss:$16 sps:$4 sm:$0xff]  }
 0x116   : > { %641 = vmatpush1.bf16.msra.mxu0 %v2304_v24  ;;  %682 = vmatpush1.bf16.msra.mxu1 %v2305_v25  ;;  %v2353_v57 = vld [vmem:[%s3261_s20 + $0x2a4] ss:$16 sps:$4 sm:$0xff]   ;;  %v2351_v59 = vld [vmem:[%s3261_s20 + $0x2a0] ss:$16 sps:$4 sm:$0xff]  }
 0x117   : > { %642 = vmatprep.subr.bf16.mxu0 %v2306_v26  ;;  %683 = vmatprep.subr.bf16.mxu1 %v2308_v27  ;;  %v2356_v60 = vld [vmem:[%s3261_s20 + $0xc4] ss:$16 sps:$4 sm:$0xff]   ;;  %v2354_v62 = vld [vmem:[%s3261_s20 + $0xc0] ss:$16 sps:$4 sm:$0xff]  }
 0x118   : > { %v2359_v61 = vld [vmem:[%s3261_s20 + $0x2c4] ss:$16 sps:$4 sm:$0xff]   ;;  %v2357_v63 = vld [vmem:[%s3261_s20 + $0x2c0] ss:$16 sps:$4 sm:$0xff]  }
 0x119   : > { %v2362_v0 = vld [vmem:[%s3261_s20 + $0xe4] ss:$16 sps:$4 sm:$0xff]   ;;  %v2360_v2 = vld [vmem:[%s3261_s20 + $0xe0] ss:$16 sps:$4 sm:$0xff]  }
 0x11a   : > { %643 = vmatpush1.bf16.msra.mxu0 %v2310_v28  ;;  %684 = vmatpush1.bf16.msra.mxu1 %v2311_v29  ;;  %v2365_v1 = vld [vmem:[%s3261_s20 + $0x2e4] ss:$16 sps:$4 sm:$0xff]   ;;  %v2363_v3 = vld [vmem:[%s3261_s20 + $0x2e0] ss:$16 sps:$4 sm:$0xff]  }
 0x11b   : > { %644 = vmatprep.subr.bf16.mxu0 %v2312_v30  ;;  %685 = vmatprep.subr.bf16.mxu1 %v2314_v31  ;;  %v2368_v4 = vld [vmem:[%s3261_s20 + $0x104] ss:$16 sps:$4 sm:$0xff]   ;;  %v2366_v6 = vld [vmem:[%s3261_s20 + $0x100] ss:$16 sps:$4 sm:$0xff]  }
 0x11c   : > { %v2371_v5 = vld [vmem:[%s3261_s20 + $0x304] ss:$16 sps:$4 sm:$0xff]   ;;  %v2369_v7 = vld [vmem:[%s3261_s20 + $0x300] ss:$16 sps:$4 sm:$0xff]  }
 0x11d   : > { %v2374_v8 = vld [vmem:[%s3261_s20 + $0x124] ss:$16 sps:$4 sm:$0xff]   ;;  %v2372_v10 = vld [vmem:[%s3261_s20 + $0x120] ss:$16 sps:$4 sm:$0xff]  }
 0x11e   : > { %645 = vmatpush1.bf16.msra.mxu0 %v2316_v32  ;;  %686 = vmatpush1.bf16.msra.mxu1 %v2317_v33  ;;  %v2377_v9 = vld [vmem:[%s3261_s20 + $0x324] ss:$16 sps:$4 sm:$0xff]   ;;  %v2375_v11 = vld [vmem:[%s3261_s20 + $0x320] ss:$16 sps:$4 sm:$0xff]  }
 0x11f   : > { %1492 = vmatprep.subr.bf16.mxu0 %v2320_v35  ;;  %1533 = vmatprep.subr.bf16.mxu1 %v2323_v36  ;;  %v2380_v12 = vld [vmem:[%s3261_s20 + $0x144] ss:$16 sps:$4 sm:$0xff]   ;;  %v2378_v14 = vld [vmem:[%s3261_s20 + $0x140] ss:$16 sps:$4 sm:$0xff]   ;;  %v2416_v36 = vld [vmem:[%s3261_s20 + $0xc] ss:$16 sps:$4 sm:$0xff]  }
 0x120   : > { %v2383_v13 = vld [vmem:[%s3261_s20 + $0x344] ss:$16 sps:$4 sm:$0xff]   ;;  %v2381_v15 = vld [vmem:[%s3261_s20 + $0x340] ss:$16 sps:$4 sm:$0xff]  }
 0x121   : > { %663 = vmatmul.mubr.bf16.vlgmr.msra.gmra.mrb[0].mxu0 %v415_v37  ;;  %704 = vmatmul.mubr.bf16.vlgmr.msra.gmra.mrb[0].mxu1 %v415_v37  ;;  %v2386_v16 = vld [vmem:[%s3261_s20 + $0x164] ss:$16 sps:$4 sm:$0xff]   ;;  %v2384_v18 = vld [vmem:[%s3261_s20 + $0x160] ss:$16 sps:$4 sm:$0xff]   ;;  %v2419_v37 = vld [vmem:[%s3261_s20 + $0x20c] ss:$16 sps:$4 sm:$0xff]  }
 0x122   : > { %1493 = vmatpush1.bf16.msra.mxu0 %v2318_v38  ;;  %1534 = vmatpush1.bf16.msra.mxu1 %v2321_v39  ;;  %v2389_v17 = vld [vmem:[%s3261_s20 + $0x364] ss:$16 sps:$4 sm:$0xff]   ;;  %v2387_v19 = vld [vmem:[%s3261_s20 + $0x360] ss:$16 sps:$4 sm:$0xff]   ;;  %v450_v38 = vlaneseq }
 0x123   : > { %1494 = vmatprep.subr.bf16.mxu0 %v2326_v40  ;;  %1535 = vmatprep.subr.bf16.mxu1 %v2329_v41  ;;  %v2392_v20 = vld [vmem:[%s3261_s20 + $0x184] ss:$16 sps:$4 sm:$0xff]   ;;  %v2390_v22 = vld [vmem:[%s3261_s20 + $0x180] ss:$16 sps:$4 sm:$0xff]  }
 0x124   : > { %v2395_v21 = vld [vmem:[%s3261_s20 + $0x384] ss:$16 sps:$4 sm:$0xff]   ;;  %v2393_v23 = vld [vmem:[%s3261_s20 + $0x380] ss:$16 sps:$4 sm:$0xff]   ;;  %v3379_v39 = vshrl.u32 %v450_v38, 7 }
 0x125   : > { %v2398_v24 = vld [vmem:[%s3261_s20 + $0x1a4] ss:$16 sps:$4 sm:$0xff]   ;;  %v2396_v26 = vld [vmem:[%s3261_s20 + $0x1a0] ss:$16 sps:$4 sm:$0xff]   ;;  %v2465_v38 = vld [vmem:[%s3261_s20 + $0x308] ss:$16 sps:$4 sm:$0xff]  }
 0x126   : > { %1495 = vmatpush1.bf16.msra.mxu0 %v2324_v42  ;;  %1536 = vmatpush1.bf16.msra.mxu1 %v2327_v43  ;;  %v2401_v25 = vld [vmem:[%s3261_s20 + $0x3a4] ss:$16 sps:$4 sm:$0xff]   ;;  %v2399_v27 = vld [vmem:[%s3261_s20 + $0x3a0] ss:$16 sps:$4 sm:$0xff]   ;;  %v452_v40 = vsub.s32 0, %v3379_v39  ;;  %v460_v41 = vsub.s32 2, %v3379_v39 }
 0x127   : > { %1496 = vmatprep.subr.bf16.mxu0 %v2332_v44  ;;  %1537 = vmatprep.subr.bf16.mxu1 %v2335_v45  ;;  %v2404_v28 = vld [vmem:[%s3261_s20 + $0x1c4] ss:$16 sps:$4 sm:$0xff]   ;;  %v2402_v30 = vld [vmem:[%s3261_s20 + $0x1c0] ss:$16 sps:$4 sm:$0xff]   ;;  %v448_v42 = vld [vmem:[%s339_s17] sm:$0xf] }
 0x128   : > { %v2407_v29 = vld [vmem:[%s3261_s20 + $0x3c4] ss:$16 sps:$4 sm:$0xff]   ;;  %v2405_v31 = vld [vmem:[%s3261_s20 + $0x3c0] ss:$16 sps:$4 sm:$0xff]   ;;  %v456_v43 = vsub.s32 1, %v3379_v39  ;;  %v464_v44 = vsub.s32 3, %v3379_v39  ;;  %v453_v45 = vrot.slane %v448_v42, %v452_v40 }
 0x129   : > { %v2410_v32 = vld [vmem:[%s3261_s20 + $0x1e4] ss:$16 sps:$4 sm:$0xff]   ;;  %v2408_v34 = vld [vmem:[%s3261_s20 + $0x1e0] ss:$16 sps:$4 sm:$0xff]  }
 0x12a   : > { %1497 = vmatpush1.bf16.msra.mxu0 %v2330_v46  ;;  %1538 = vmatpush1.bf16.msra.mxu1 %v2333_v47  ;;  %v2413_v33 = vld [vmem:[%s3261_s20 + $0x3e4] ss:$16 sps:$4 sm:$0xff]   ;;  %v2411_v35 = vld [vmem:[%s3261_s20 + $0x3e0] ss:$16 sps:$4 sm:$0xff]   ;;  %v461_v46 = vrot.slane %v448_v42, %v460_v41  ;;  %v457_v47 = vrot.slane %v448_v42, %v456_v43 }
 0x12b   : > { %1498 = vmatprep.subr.bf16.mxu0 %v2338_v48  ;;  %1539 = vmatprep.subr.bf16.mxu1 %v2341_v49  ;;  %v465_v48 = vrot.slane %v448_v42, %v464_v44  ;;  %v2470_v42 = vld [vmem:[%s3261_s20 + $0x12c] ss:$16 sps:$4 sm:$0xff]  }
 0x12e   : > { %1499 = vmatpush1.bf16.msra.mxu0 %v2336_v50  ;;  %1540 = vmatpush1.bf16.msra.mxu1 %v2339_v51 }
 0x12f   : > { %1500 = vmatprep.subr.bf16.mxu0 %v2344_v52  ;;  %1541 = vmatprep.subr.bf16.mxu1 %v2347_v53 }
 0x132   : > { %1501 = vmatpush1.bf16.msra.mxu0 %v2342_v54  ;;  %1542 = vmatpush1.bf16.msra.mxu1 %v2345_v55 }
 0x133   : > { %1502 = vmatprep.subr.bf16.mxu0 %v2350_v56  ;;  %1543 = vmatprep.subr.bf16.mxu1 %v2353_v57 }
 0x136   : > { %1503 = vmatpush1.bf16.msra.mxu0 %v2348_v58  ;;  %1544 = vmatpush1.bf16.msra.mxu1 %v2351_v59 }
 0x137   : > { %1504 = vmatprep.subr.bf16.mxu0 %v2356_v60  ;;  %1545 = vmatprep.subr.bf16.mxu1 %v2359_v61 }
 0x13a   : > { %1505 = vmatpush1.bf16.msra.mxu0 %v2354_v62  ;;  %1546 = vmatpush1.bf16.msra.mxu1 %v2357_v63 }
 0x13b   : > { %1506 = vmatprep.subr.bf16.mxu0 %v2362_v0  ;;  %1547 = vmatprep.subr.bf16.mxu1 %v2365_v1 }
 0x13e   : > { %1507 = vmatpush1.bf16.msra.mxu0 %v2360_v2  ;;  %1548 = vmatpush1.bf16.msra.mxu1 %v2363_v3  ;;  %v2414_v3 = vld [vmem:[%s3261_s20 + $0x8] ss:$16 sps:$4 sm:$0xff]  }
 0x13f   : > { %1508 = vmatprep.subr.bf16.mxu0 %v2368_v4  ;;  %1549 = vmatprep.subr.bf16.mxu1 %v2371_v5  ;;  %v2417_v4 = vld [vmem:[%s3261_s20 + $0x208] ss:$16 sps:$4 sm:$0xff]  }
 0x142   : > { %1509 = vmatpush1.bf16.msra.mxu0 %v2366_v6  ;;  %1550 = vmatpush1.bf16.msra.mxu1 %v2369_v7  ;;  %v2422_v7 = vld [vmem:[%s3261_s20 + $0x2c] ss:$16 sps:$4 sm:$0xff]  }
 0x143   : > { %1510 = vmatprep.subr.bf16.mxu0 %v2374_v8  ;;  %1551 = vmatprep.subr.bf16.mxu1 %v2377_v9  ;;  %v2425_v8 = vld [vmem:[%s3261_s20 + $0x22c] ss:$16 sps:$4 sm:$0xff]   ;;  %v2420_v9 = vld [vmem:[%s3261_s20 + $0x28] ss:$16 sps:$4 sm:$0xff]  }
 0x146   : > { %1511 = vmatpush1.bf16.msra.mxu0 %v2372_v10  ;;  %1552 = vmatpush1.bf16.msra.mxu1 %v2375_v11  ;;  %v2423_v10 = vld [vmem:[%s3261_s20 + $0x228] ss:$16 sps:$4 sm:$0xff]   ;;  %v2428_v11 = vld [vmem:[%s3261_s20 + $0x4c] ss:$16 sps:$4 sm:$0xff]  }
 0x147   : > { %1512 = vmatprep.subr.bf16.mxu0 %v2380_v12  ;;  %1553 = vmatprep.subr.bf16.mxu1 %v2383_v13  ;;  %v2431_v12 = vld [vmem:[%s3261_s20 + $0x24c] ss:$16 sps:$4 sm:$0xff]   ;;  %v2426_v13 = vld [vmem:[%s3261_s20 + $0x48] ss:$16 sps:$4 sm:$0xff]  }
 0x14a   : > { %1513 = vmatpush1.bf16.msra.mxu0 %v2378_v14  ;;  %1554 = vmatpush1.bf16.msra.mxu1 %v2381_v15  ;;  %v2429_v14 = vld [vmem:[%s3261_s20 + $0x248] ss:$16 sps:$4 sm:$0xff]   ;;  %v2434_v15 = vld [vmem:[%s3261_s20 + $0x6c] ss:$16 sps:$4 sm:$0xff]  }
 0x14b   : > { %1514 = vmatprep.subr.bf16.mxu0 %v2386_v16  ;;  %1555 = vmatprep.subr.bf16.mxu1 %v2389_v17  ;;  %v2437_v16 = vld [vmem:[%s3261_s20 + $0x26c] ss:$16 sps:$4 sm:$0xff]   ;;  %v2432_v17 = vld [vmem:[%s3261_s20 + $0x68] ss:$16 sps:$4 sm:$0xff]  }
 0x14e   : > { %1515 = vmatpush1.bf16.msra.mxu0 %v2384_v18  ;;  %1556 = vmatpush1.bf16.msra.mxu1 %v2387_v19  ;;  %v2435_v18 = vld [vmem:[%s3261_s20 + $0x268] ss:$16 sps:$4 sm:$0xff]   ;;  %v2440_v19 = vld [vmem:[%s3261_s20 + $0x8c] ss:$16 sps:$4 sm:$0xff]  }
 0x14f   : > { %1516 = vmatprep.subr.bf16.mxu0 %v2392_v20  ;;  %1557 = vmatprep.subr.bf16.mxu1 %v2395_v21  ;;  %v2443_v20 = vld [vmem:[%s3261_s20 + $0x28c] ss:$16 sps:$4 sm:$0xff]   ;;  %v2438_v21 = vld [vmem:[%s3261_s20 + $0x88] ss:$16 sps:$4 sm:$0xff]  }
 0x152   : > { %1517 = vmatpush1.bf16.msra.mxu0 %v2390_v22  ;;  %1558 = vmatpush1.bf16.msra.mxu1 %v2393_v23  ;;  %v2441_v22 = vld [vmem:[%s3261_s20 + $0x288] ss:$16 sps:$4 sm:$0xff]   ;;  %v2446_v23 = vld [vmem:[%s3261_s20 + $0xac] ss:$16 sps:$4 sm:$0xff]  }
 0x153   : > { %1518 = vmatprep.subr.bf16.mxu0 %v2398_v24  ;;  %1559 = vmatprep.subr.bf16.mxu1 %v2401_v25  ;;  %v2449_v24 = vld [vmem:[%s3261_s20 + $0x2ac] ss:$16 sps:$4 sm:$0xff]   ;;  %v2444_v25 = vld [vmem:[%s3261_s20 + $0xa8] ss:$16 sps:$4 sm:$0xff]  }
 0x156   : > { %1519 = vmatpush1.bf16.msra.mxu0 %v2396_v26  ;;  %1560 = vmatpush1.bf16.msra.mxu1 %v2399_v27  ;;  %v2447_v26 = vld [vmem:[%s3261_s20 + $0x2a8] ss:$16 sps:$4 sm:$0xff]   ;;  %v2452_v27 = vld [vmem:[%s3261_s20 + $0xcc] ss:$16 sps:$4 sm:$0xff]  }
 0x157   : > { %1520 = vmatprep.subr.bf16.mxu0 %v2404_v28  ;;  %1561 = vmatprep.subr.bf16.mxu1 %v2407_v29  ;;  %v2455_v28 = vld [vmem:[%s3261_s20 + $0x2cc] ss:$16 sps:$4 sm:$0xff]   ;;  %v2450_v29 = vld [vmem:[%s3261_s20 + $0xc8] ss:$16 sps:$4 sm:$0xff]  }
 0x15a   : > { %1521 = vmatpush1.bf16.msra.mxu0 %v2402_v30  ;;  %1562 = vmatpush1.bf16.msra.mxu1 %v2405_v31  ;;  %v2453_v30 = vld [vmem:[%s3261_s20 + $0x2c8] ss:$16 sps:$4 sm:$0xff]   ;;  %v2458_v31 = vld [vmem:[%s3261_s20 + $0xec] ss:$16 sps:$4 sm:$0xff]  }
 0x15b   : > { %1522 = vmatprep.subr.bf16.mxu0 %v2410_v32  ;;  %1563 = vmatprep.subr.bf16.mxu1 %v2413_v33  ;;  %v2461_v32 = vld [vmem:[%s3261_s20 + $0x2ec] ss:$16 sps:$4 sm:$0xff]   ;;  %v2456_v33 = vld [vmem:[%s3261_s20 + $0xe8] ss:$16 sps:$4 sm:$0xff]  }
 0x15e   : > { %1523 = vmatpush1.bf16.msra.mxu0 %v2408_v34  ;;  %1564 = vmatpush1.bf16.msra.mxu1 %v2411_v35  ;;  %v2459_v34 = vld [vmem:[%s3261_s20 + $0x2e8] ss:$16 sps:$4 sm:$0xff]   ;;  %v2464_v35 = vld [vmem:[%s3261_s20 + $0x10c] ss:$16 sps:$4 sm:$0xff]  }
 0x15f   : > { %1574 = vmatprep.subr.bf16.mxu0 %v2416_v36  ;;  %1615 = vmatprep.subr.bf16.mxu1 %v2419_v37  ;;  %v2467_v36 = vld [vmem:[%s3261_s20 + $0x30c] ss:$16 sps:$4 sm:$0xff]   ;;  %v2462_v37 = vld [vmem:[%s3261_s20 + $0x108] ss:$16 sps:$4 sm:$0xff]  }
 0x1f4   : > { %v664_v49 = vpop.f32.mrb[0].mxu0  ;;  %v705_v50 = vpop.f32.mrb[0].mxu1 }
 0x1f5   : > { %v665_v51 = vadd.f32 %v664_v49, %v453_v45  ;;  %v706_v52 = vadd.f32 %v705_v50, %v461_v46  ;;  %v666_v53 = vpop.f32.mrb[1].mxu0  ;;  %v707_v54 = vpop.f32.mrb[1].mxu1  ;;  %v2473_v45 = vld [vmem:[%s3261_s20 + $0x32c] ss:$16 sps:$4 sm:$0xff]   ;;  %v2468_v46 = vld [vmem:[%s3261_s20 + $0x128] ss:$16 sps:$4 sm:$0xff]  }
 0x1f6   : > { %v667_v55 = vadd.f32 %v666_v53, %v457_v47  ;;  %v708_v56 = vadd.f32 %v707_v54, %v465_v48  ;;  %v668_v57 = vpop.f32.mrb[2].mxu0  ;;  %v709_v58 = vpop.f32.mrb[2].mxu1  ;;  %v2471_v47 = vld [vmem:[%s3261_s20 + $0x328] ss:$16 sps:$4 sm:$0xff]   ;;  %v2476_v48 = vld [vmem:[%s3261_s20 + $0x14c] ss:$16 sps:$4 sm:$0xff]  }
 0x1f7   : > { %v712_v59 = vmax.f32 %v665_v51, 0.0  ;;  %v714_v60 = vmax.f32 %v706_v52, 0.0  ;;  %v669_v61 = vpop.f32.mrb[3].mxu0  ;;  %v710_v62 = vpop.f32.mrb[3].mxu1  ;;  %v2479_v49 = vld [vmem:[%s3261_s20 + $0x34c] ss:$16 sps:$4 sm:$0xff]  }
 0x1f8   : > { %v713_v63 = vmax.f32 %v667_v55, 0.0  ;;  %v715_v0 = vmax.f32 %v708_v56, 0.0  ;;  %v2474_v50 = vld [vmem:[%s3261_s20 + $0x148] ss:$16 sps:$4 sm:$0xff]   ;;  %v2482_v52 = vld [vmem:[%s3261_s20 + $0x16c] ss:$16 sps:$4 sm:$0xff]  }
 0x1f9   : > { %v3397_v5 = vpack.c.bf16 %v712_v59, %v712_v59  ;;  %v3399_v6 = vpack.c.bf16 %v714_v60, %v714_v60  ;;  %v2477_v51 = vld [vmem:[%s3261_s20 + $0x348] ss:$16 sps:$4 sm:$0xff]   ;;  %v2485_v53 = vld [vmem:[%s3261_s20 + $0x36c] ss:$16 sps:$4 sm:$0xff]  }
 0x1fa   : > { %v721_v1 = vpack.c.bf16 %v713_v63, %v713_v63  ;;  %v723_v2 = vpack.c.bf16 %v715_v0, %v715_v0  ;;  %v2480_v54 = vld [vmem:[%s3261_s20 + $0x168] ss:$16 sps:$4 sm:$0xff]   ;;  %v2488_v56 = vld [vmem:[%s3261_s20 + $0x18c] ss:$16 sps:$4 sm:$0xff]  }
 0x1fb   : > { %v2483_v55 = vld [vmem:[%s3261_s20 + $0x368] ss:$16 sps:$4 sm:$0xff]   ;;  %v2491_v57 = vld [vmem:[%s3261_s20 + $0x38c] ss:$16 sps:$4 sm:$0xff]  }
 0x1fc   : > { %1524 = vmatprep.mubr.bf16.mxu0 %v721_v1  ;;  %1565 = vmatprep.mubr.bf16.mxu1 %v723_v2  ;;  %v2486_v58 = vld [vmem:[%s3261_s20 + $0x188] ss:$16 sps:$4 sm:$0xff]   ;;  %v2494_v60 = vld [vmem:[%s3261_s20 + $0x1ac] ss:$16 sps:$4 sm:$0xff]  }
 0x1fd   : > { %1525 = vmatmul.mubr.bf16.vlgmr.msra.gmra.mrb[4].mxu0 %v3397_v5  ;;  %1566 = vmatmul.mubr.bf16.vlgmr.msra.gmra.mrb[4].mxu1 %v3399_v6  ;;  %v2489_v59 = vld [vmem:[%s3261_s20 + $0x388] ss:$16 sps:$4 sm:$0xff]   ;;  %v2497_v61 = vld [vmem:[%s3261_s20 + $0x3ac] ss:$16 sps:$4 sm:$0xff]  }
 0x1fe   : > { %1575 = vmatpush1.bf16.msra.mxu0 %v2414_v3  ;;  %1616 = vmatpush1.bf16.msra.mxu1 %v2417_v4  ;;  %v2492_v62 = vld [vmem:[%s3261_s20 + $0x1a8] ss:$16 sps:$4 sm:$0xff]   ;;  %v2500_v0 = vld [vmem:[%s3261_s20 + $0x1cc] ss:$16 sps:$4 sm:$0xff]  }
 0x1ff   : > { %1606 = vmatprep.mubr.bf16.mxu0 %v721_v1  ;;  %1647 = vmatprep.mubr.bf16.mxu1 %v723_v2  ;;  %v2495_v63 = vld [vmem:[%s3261_s20 + $0x3a8] ss:$16 sps:$4 sm:$0xff]   ;;  %v2503_v1 = vld [vmem:[%s3261_s20 + $0x3cc] ss:$16 sps:$4 sm:$0xff]  }
 0x200   : > { %1576 = vmatprep.subr.bf16.mxu0 %v2422_v7  ;;  %1617 = vmatprep.subr.bf16.mxu1 %v2425_v8  ;;  %v2498_v2 = vld [vmem:[%s3261_s20 + $0x1c8] ss:$16 sps:$4 sm:$0xff]   ;;  %v2506_v4 = vld [vmem:[%s3261_s20 + $0x1ec] ss:$16 sps:$4 sm:$0xff]  }
 0x201   : > { %v2501_v3 = vld [vmem:[%s3261_s20 + $0x3c8] ss:$16 sps:$4 sm:$0xff]   ;;  %v2509_v7 = vld [vmem:[%s3261_s20 + $0x3ec] ss:$16 sps:$4 sm:$0xff]  }
 0x202   : > { %1577 = vmatpush1.bf16.msra.mxu0 %v2420_v9  ;;  %1618 = vmatpush1.bf16.msra.mxu1 %v2423_v10  ;;  %v2504_v8 = vld [vmem:[%s3261_s20 + $0x1e8] ss:$16 sps:$4 sm:$0xff]  }
 0x203   : > { %1578 = vmatprep.subr.bf16.mxu0 %v2428_v11  ;;  %1619 = vmatprep.subr.bf16.mxu1 %v2431_v12  ;;  %v2507_v9 = vld [vmem:[%s3261_s20 + $0x3e8] ss:$16 sps:$4 sm:$0xff]   ;;  %v716_v11 = vld [vmem:[#allocation2] sm:$0xff] }
 0x206   : > { %1579 = vmatpush1.bf16.msra.mxu0 %v2426_v13  ;;  %1620 = vmatpush1.bf16.msra.mxu1 %v2429_v14 }
 0x207   : > { %1580 = vmatprep.subr.bf16.mxu0 %v2434_v15  ;;  %1621 = vmatprep.subr.bf16.mxu1 %v2437_v16  ;;  %v717_v15 = vld [vmem:[#allocation2 + $0x8] sm:$0xff] }
 0x20a   : > { %1581 = vmatpush1.bf16.msra.mxu0 %v2432_v17  ;;  %1622 = vmatpush1.bf16.msra.mxu1 %v2435_v18 }
 0x20b   : > { %1582 = vmatprep.subr.bf16.mxu0 %v2440_v19  ;;  %1623 = vmatprep.subr.bf16.mxu1 %v2443_v20 }
 0x20e   : > { %1583 = vmatpush1.bf16.msra.mxu0 %v2438_v21  ;;  %1624 = vmatpush1.bf16.msra.mxu1 %v2441_v22 }
 0x20f   : > { %1584 = vmatprep.subr.bf16.mxu0 %v2446_v23  ;;  %1625 = vmatprep.subr.bf16.mxu1 %v2449_v24 }
 0x212   : > { %1585 = vmatpush1.bf16.msra.mxu0 %v2444_v25  ;;  %1626 = vmatpush1.bf16.msra.mxu1 %v2447_v26 }
 0x213   : > { %1586 = vmatprep.subr.bf16.mxu0 %v2452_v27  ;;  %1627 = vmatprep.subr.bf16.mxu1 %v2455_v28  ;;  %v719_v27 = vld [vmem:[#allocation2 + $0x18] sm:$0xff] }
 0x216   : > { %1587 = vmatpush1.bf16.msra.mxu0 %v2450_v29  ;;  %1628 = vmatpush1.bf16.msra.mxu1 %v2453_v30 }
 0x217   : > { %1588 = vmatprep.subr.bf16.mxu0 %v2458_v31  ;;  %1629 = vmatprep.subr.bf16.mxu1 %v2461_v32 }
 0x21a   : > { %1589 = vmatpush1.bf16.msra.mxu0 %v2456_v33  ;;  %1630 = vmatpush1.bf16.msra.mxu1 %v2459_v34 }
 0x21b   : > { %1590 = vmatprep.subr.bf16.mxu0 %v2464_v35  ;;  %1631 = vmatprep.subr.bf16.mxu1 %v2467_v36 }
 0x21e   : > { %1591 = vmatpush1.bf16.msra.mxu0 %v2462_v37  ;;  %1632 = vmatpush1.bf16.msra.mxu1 %v2465_v38  ;;  %v1672_v37 = vld [vmem:[%s3271_s10] sm:$0xf] (!%p2097_p0) }
 0x21f   : > { %1592 = vmatprep.subr.bf16.mxu0 %v2470_v42  ;;  %1633 = vmatprep.subr.bf16.mxu1 %v2473_v45  ;;  %v1677_v42 = vrot.slane (!%p2097_p0), %v1672_v37, %v452_v40  ;;  %v1681_v45 = vrot.slane (!%p2097_p0), %v1672_v37, %v456_v43 }
 0x222   : > { %1593 = vmatpush1.bf16.msra.mxu0 %v2468_v46  ;;  %1634 = vmatpush1.bf16.msra.mxu1 %v2471_v47  ;;  %v1685_v47 = vrot.slane (!%p2097_p0), %v1672_v37, %v460_v41 }
 0x223   : > { %1594 = vmatprep.subr.bf16.mxu0 %v2476_v48  ;;  %1635 = vmatprep.subr.bf16.mxu1 %v2479_v49  ;;  %v1689_v49 = vrot.slane (!%p2097_p0), %v1672_v37, %v464_v44 }
 0x226   : > { %1595 = vmatpush1.bf16.msra.mxu0 %v2474_v50  ;;  %1636 = vmatpush1.bf16.msra.mxu1 %v2477_v51 }
 0x227   : > { %1596 = vmatprep.subr.bf16.mxu0 %v2482_v52  ;;  %1637 = vmatprep.subr.bf16.mxu1 %v2485_v53 }
 0x22a   : > { %1597 = vmatpush1.bf16.msra.mxu0 %v2480_v54  ;;  %1638 = vmatpush1.bf16.msra.mxu1 %v2483_v55 }
 0x22b   : > { %1598 = vmatprep.subr.bf16.mxu0 %v2488_v56  ;;  %1639 = vmatprep.subr.bf16.mxu1 %v2491_v57 }
 0x22e   : > { %1599 = vmatpush1.bf16.msra.mxu0 %v2486_v58  ;;  %1640 = vmatpush1.bf16.msra.mxu1 %v2489_v59 }
 0x22f   : > { %1600 = vmatprep.subr.bf16.mxu0 %v2494_v60  ;;  %1641 = vmatprep.subr.bf16.mxu1 %v2497_v61 }
 0x232   : > { %1601 = vmatpush1.bf16.msra.mxu0 %v2492_v62  ;;  %1642 = vmatpush1.bf16.msra.mxu1 %v2495_v63 }
 0x233   : > { %1602 = vmatprep.subr.bf16.mxu0 %v2500_v0  ;;  %1643 = vmatprep.subr.bf16.mxu1 %v2503_v1 }
 0x236   : > { %1603 = vmatpush1.bf16.msra.mxu0 %v2498_v2  ;;  %1644 = vmatpush1.bf16.msra.mxu1 %v2501_v3 }
 0x237   : > { %1604 = vmatprep.subr.bf16.mxu0 %v2506_v4  ;;  %1645 = vmatprep.subr.bf16.mxu1 %v2509_v7 }
 0x23a   : > { %1605 = vmatpush1.bf16.msra.mxu0 %v2504_v8  ;;  %1646 = vmatpush1.bf16.msra.mxu1 %v2507_v9 }
 0x23d   : > { %1607 = vmatmul.mubr.bf16.vlgmr.msra.gmra.mrb[8].mxu0 %v3397_v5  ;;  %1648 = vmatmul.mubr.bf16.vlgmr.msra.gmra.mrb[8].mxu1 %v3399_v6  ;;  %v718_v5 = vld [vmem:[#allocation2 + $0x10] sm:$0xff] }
 0x2d0   : > { %v1526_v10 = vpop.f32.mrb[4].mxu0  ;;  %v1567_v12 = vpop.f32.mrb[4].mxu1 }
 0x2d1   : > { %v1568_v13 = vadd.f32 %v1567_v12, %v1526_v10  ;;  %v1528_v14 = vpop.f32.mrb[5].mxu0  ;;  %v1569_v16 = vpop.f32.mrb[5].mxu1 }
 0x2d2   : > { %v1570_v17 = vadd.f32 %v1569_v16, %v1528_v14  ;;  %v1530_v18 = vpop.f32.mrb[6].mxu0  ;;  %v1571_v19 = vpop.f32.mrb[6].mxu1 }
 0x2d3   : > { %v1656_v20 = vadd.f32 %v1568_v13, %v716_v11  ;;  %v1531_v21 = vpop.f32.mrb[7].mxu0  ;;  %v1572_v22 = vpop.f32.mrb[7].mxu1 }
 0x2d4   : > { %v1657_v23 = vadd.f32 %v1570_v17, %v717_v15 }
 0x2d5   : > { %1660 = vst [vmem:[#allocation2] sm:$0xff] %v1656_v20 }
 0x2d6   : > { %1661 = vst [vmem:[#allocation2 + $0x8] sm:$0xff] %v1657_v23 }
 0x2dc   : > { %v1668_v36 = vld [vmem:[#allocation2] sm:$0xff] (!%p2097_p0) }
 0x2dd   : > { %v1669_v38 = vld [vmem:[#allocation2 + $0x8] sm:$0xff] (!%p2097_p0)  ;;  %v1694_v50 = vadd.f32 (!%p2097_p0), %v1677_v42, %v1668_v36 }
 0x2de   : > { %v1695_v51 = vadd.f32 (!%p2097_p0), %v1681_v45, %v1669_v38 }
 0x2df   : > { %v2098_v54 = vmul.f32 (!%p2097_p0), -1.442695, %v1694_v50 }
 0x2e0   : > { %v2099_v55 = vmul.f32 (!%p2097_p0), -1.442695, %v1695_v51 }
 0x2e1   : > { %2510 = vpow2.f32 (!%p2097_p0), %v2098_v54 }
 0x2e2   : > { %2512 = vpow2.f32 (!%p2097_p0), %v2099_v55 }
 0x2eb   : > { %v2511_v40 = vpop.eup (!%p2097_p0), %2510 }
 0x2ec   : > { %v2513_v41 = vpop.eup (!%p2097_p0), %2512  ;;  %v1710_v43 = vadd.f32 (!%p2097_p0), 1.0, %v2511_v40 }
 0x2ed   : > { %v1711_v44 = vadd.f32 (!%p2097_p0), 1.0, %v2513_v41 }
 0x310   : > { %v1608_v24 = vpop.f32.mrb[8].mxu0  ;;  %v1649_v25 = vpop.f32.mrb[8].mxu1  ;;  %1667 = sbr.rel (%p2097_p0) target bundleno = 827 (0x33b), region = 68 }
 0x311   : > { %v1650_v6 = vadd.f32 %v1649_v25, %v1608_v24  ;;  %v1610_v26 = vpop.f32.mrb[9].mxu0  ;;  %v1651_v28 = vpop.f32.mrb[9].mxu1 }
 0x312   : > { %v1652_v29 = vadd.f32 %v1651_v28, %v1610_v26  ;;  %v1612_v30 = vpop.f32.mrb[10].mxu0  ;;  %v1653_v31 = vpop.f32.mrb[10].mxu1 }
 0x313   : > { %v1658_v32 = vadd.f32 %v1650_v6, %v718_v5  ;;  %v1613_v33 = vpop.f32.mrb[11].mxu0  ;;  %v1654_v34 = vpop.f32.mrb[11].mxu1 }
 0x314   : > { %v1659_v35 = vadd.f32 %v1652_v29, %v719_v27 }
 0x315   : > { %1662 = vst [vmem:[#allocation2 + $0x10] sm:$0xff] %v1658_v32 }
 0x316   : > { %1663 = vst [vmem:[#allocation2 + $0x18] sm:$0xff] %v1659_v35 }
 0x31c   : > { %v1670_v46 = vld [vmem:[#allocation2 + $0x10] sm:$0xff] }
 0x31d   : > { %v1671_v48 = vld [vmem:[#allocation2 + $0x18] sm:$0xff]  ;;  %v1696_v52 = vadd.f32 %v1685_v47, %v1670_v46 }
 0x31e   : > { %v1697_v53 = vadd.f32 %v1689_v49, %v1671_v48 }
 0x31f   : > { %v2100_v56 = vmul.f32 -1.442695, %v1696_v52 }
 0x320   : > { %v2101_v57 = vmul.f32 -1.442695, %v1697_v53 }
 0x321   : > { %2514 = vpow2.f32 %v2100_v56 }
 0x322   : > { %2516 = vpow2.f32 %v2101_v57 }
 0x323   : > { %2518 = vrcp.f32 %v1710_v43 }
 0x324   : > { %2520 = vrcp.f32 %v1711_v44 }
 0x32b   : > { %v2515_v39 = vpop.eup %2514 }
 0x32c   : > { %v2517_v58 = vpop.eup %2516  ;;  %v1712_v59 = vadd.f32 1.0, %v2515_v39 }
 0x32d   : > { %v1713_v60 = vadd.f32 1.0, %v2517_v58  ;;  %v2519_v61 = vpop.eup %2518 }
 0x32e   : > { %2522 = vrcp.f32 %v1712_v59  ;;  %v2521_v62 = vpop.eup %2520  ;;  %1722 = vst [vmem:[%s3278_s27] sm:$0xff] %v2519_v61 }
 0x32f   : > { %2524 = vrcp.f32 %v1713_v60  ;;  %1723 = vst [vmem:[%s3278_s27 + $0x8] sm:$0xff] %v2521_v62 }
 0x338   : > { %v2523_v63 = vpop.eup %2522 }
 0x339   : > { %v2525_v0 = vpop.eup %2524  ;;  %1724 = vst [vmem:[%s3278_s27 + $0x10] sm:$0xff] %v2523_v63 }
 0x33a   : > { %1725 = vst [vmem:[%s3278_s27 + $0x18] sm:$0xff] %v2525_v0 }
 0x33b PF: > { %s3641_s8 = sld [smem:[#allocation22_spill]]  ;;  %s3642_s4 = sld [smem:[#allocation32_spill]] }
 0x33c   : > { %s1743_s19 = sshll.u32 %s3278_s27, 4  ;;  %s1727_s17 = scalar_lea.sflag [#allocation5], %s3268_s11  ;;  %s1744_s19 = int_to_ptr.vmem [resolvable:$true] %s1743_s19 }
 0x33d   : > { %s2674_s12 = scalar_lea.vmem %s1744_s19, 512  ;;  %p3643_p8 = scmp.ne.s32.totalorder %s3624_s5, 0 }
 0x33e   : > { %p2675_p1 = scmp.ne.s32.totalorder %s1744_s19, %s2674_s12  ;;  %s2845_s20 = smov [#allocation12]  }
 0x33f   : > { %s2678_s13 = sshll.u32 %s2845_s20, 4  ;;  %s2679_s13 = int_to_ptr.vmem [resolvable:$false] %s2678_s13 }
 0x340   : > { %p2676_p3 = pnand %p2675_p1, %p3643_p8  ;;  %s2680_s21 = scalar_lea.vmem %s2679_s13, 1024 }
 0x341   : > { %s2111_s28 = sshll.u32 %s3641_s8, 9  ;;  %p2681_p7 = scmp.lt.s32.totalorder %s1744_s19, %s2679_s13 }
 0x342   : > { %s3483_s24 = scalar_lea.hbm %s3642_s4, %s2111_s28  ;;  %p2677_p12 = pneg %p2676_p3 }
 0x343   : > { %p2682_p11 = scmp.lt.s32.totalorder %s2680_s21, %s2674_s12 }
 0x345   : > { %p2683_p6 = por %p2682_p11, %p2681_p7 }
 0x347   : > { %p2684_p4 = pnand %p2683_p6, %p2677_p12 }
 0x349   : > { %2687 = shalt.err (!%p2684_p4)
}
 0x34a   : > { %s2688_s11 = scalar_lea.hbm %s3483_s24, 512  ;;  %s2692_s27 = scalar_lea.hbm %s3642_s4, 1024 }
 0x34b   : > { %p2689_p5 = scmp.ne.s32.totalorder %s3483_s24, %s2688_s11  ;;  %p2693_p10 = scmp.lt.u32.totalorder %s3483_s24, %s3642_s4 }
 0x34c   : > { %p2694_p2 = scmp.lt.u32.totalorder %s2692_s27, %s2688_s11  ;;  %p2696_p1 = scmp.lt.u32.totalorder %s2688_s11, %s3483_s24 }
 0x34d   : > { %p2690_p9 = pnand %p2689_p5, %p3643_p8 }
 0x34e   : > { %p2695_p0 = por %p2694_p2, %p2693_p10 }
 0x34f   : > { %p2691_p13 = pneg %p2690_p9 }
 0x350   : > { %p2697_p3 = por %p2696_p1, %p2695_p0 }
 0x352   : > { %p2698_p12 = pnand %p2697_p3, %p2691_p13 }
 0x354   : > { %2701 = shalt.err (!%p2698_p12)
}
 0x355   : > { %2124 = dma.vmem_to_hbm [thread:$0]  (%p3643_p8), %s1744_s19, 512, %s3483_s24, %s1727_s17  }
 0x356 PF: > { %s3644_s8 = sld [smem:[#allocation18_spill]]  ;;  %p2150_p7 = scmp.ge.s32.totalorder %s2832_s6, 2 }
 0x357   : > { %p3645_p11 = scmp.ne.s32.totalorder %s3627_s14, 0 }
 0x359   : > { %p2144_p6 = pnand %p2150_p7, %p3645_p11 }
 0x35c   : > { %s1755_s28 = sand.u32 1, %s3644_s8  }
 0x35d   : > { %s1756_s7 = scalar_lea.sflag [#allocation5], %s1755_s28 }
 0x35e   : > { %2775 = dma.done.wait (!%p2144_p6), %s1756_s7, 512  }
 0x35f   : > { %2777 = vsyncadd (!%p2144_p6), %s1756_s7, 4294966784  ;;  %s25_s6 = sadd.s32 1, %s2832_s6   ;;  %s3647_s18 = sld [smem:[#allocation19_spill]] }
 0x360   : > { %p3509_p4 = scmp.ge.s32.totalorder %s25_s6, 18   ;;  %s3648_s19 = sld [smem:[#allocation20_spill]] }
 0x361   : > { %s3649_s5 = sld [smem:[#allocation26_spill]]  ;;  %s3650_s14 = sld [smem:[#allocation24_spill]] }
 0x362   : > { %s3651_s20 = smov %s3669_s1  ;;  %s3652_s21 = smov %s2796_s22 }
 0x363   : > { %s3653_s22 = smov %s2800_s23  ;;  %s3654_s23 = smov %s3205_s16 }
 0x364   : > { %s3655_s24 = smov %s2808_s25  ;;  %s3656_s25 = smov %s2812_s26 }
 0x365   : > { %s3658_s27 = smov %s2824_s29  ;;  %s3659_s28 = smov %s2828_s30 }
 0x366   : > { %s3661_s30 = smov %s3667_s15  ;;  %24 = sbr.rel (!%p3509_p4) target bundleno = 20 (0x14), region = 134 }
 0x367   : > { %s3657_s26 = smov %s3649_s5  ;;  %s3660_s29 = smov %s3650_s14 }
 0x36d   :  { %1761 = vsyncpa [#allocation4], 1 }
 0x36e   :  { %1763 = vsyncpa [#allocation4 + $0x1], 1 }
 0x36f   :  { %1764 = vsyncpa [#allocation7], 1 }
 0x370   :  { %1766 = vsyncpa [#allocation7 + $0x1], 1 }
 0x371   :  { %1767 = vsyncpa [#allocation10], 1 }
 0x372   :  { %1769 = vsyncpa [#allocation10 + $0x1], 1 }
 0x373   :  { %1770 = vsyncpa [#allocation5], 1 }
 0x374   :  { %1772 = vsyncpa [#allocation5 + $0x1], 1 }

</bundles_post_ra>
